<compile_context>
chip_gen: v7x
topology: tpu7x:2x2x1
jax: 0.10.0
libtpu: 0.0.40
codegen_flags: <defaults>
</compile_context>

<pallas_src>
import math

import jax
import jax.numpy as jnp
from jax.experimental import pallas as pl
from jax.experimental.pallas import tpu as pltpu


# ------------------------------ Pallas kernel -------------------------------

def _sigmoid(x):
    # Elementwise logistic; exp goes to the EUP slot.
    return 1.0 / (1.0 + jnp.exp(-x))


def gcn_net_kernel(adj_ref, x_ref, w1_ref, b1_ref, w2_ref, b2_ref, out_ref):
    adj = adj_ref[...]                                   # (N, N) loaded once, reused

    # --- GraphConvolution 1: sigmoid(adj @ (x @ W1) + b1) ---
    support1 = jnp.dot(x_ref[...], w1_ref[...],
                       preferred_element_type=jnp.float32)          # (N, hid)
    h = _sigmoid(jnp.dot(adj, support1,
                         preferred_element_type=jnp.float32) + b1_ref[...])
    # F.relu in GcnNet.forward (identity after sigmoid, kept for literal
    # fidelity; it costs one VPU max which is hidden under MXU slack).
    h = jnp.maximum(h, 0.0)

    # --- GraphConvolution 2: sigmoid(adj @ (h @ W2) + b2) ---
    support2 = jnp.dot(h, w2_ref[...],
                       preferred_element_type=jnp.float32)          # (N, out)
    out_ref[...] = _sigmoid(jnp.dot(adj, support2,
                                    preferred_element_type=jnp.float32)
                            + b2_ref[...])


# ------------------------------- wrapper -------------------------------------

def gcn_net_forward(adjacency, feature, params):
    """Fused GcnNet.forward: logits = gcn2(adj, relu(gcn1(adj, feature)))."""
    N = adjacency.shape[0]
    in_dim = feature.shape[1]
    hid = params["w1"].shape[1]
    out_dim = params["w2"].shape[1]

    flops = 2 * N * (in_dim * hid + N * hid + hid * out_dim + N * out_dim)
    bytes_accessed = 4 * (adjacency.size + feature.size
                          + params["w1"].size + params["b1"].size
                          + params["w2"].size + params["b2"].size
                          + N * out_dim)

    return pl.pallas_call(
        gcn_net_kernel,
        out_shape=jax.ShapeDtypeStruct((N, out_dim), jnp.float32),
        # No grid: single invocation, whole arrays resident in VMEM, params
        # staged exactly once.
        in_specs=[pl.BlockSpec(memory_space=pltpu.MemorySpace.VMEM)] * 6,
        out_specs=pl.BlockSpec(memory_space=pltpu.MemorySpace.VMEM),
        cost_estimate=pl.CostEstimate(
            flops=flops,
            transcendentals=N * (hid + out_dim),   # two sigmoids
            bytes_accessed=bytes_accessed),
    )(adjacency, feature,
      params["w1"], params["b1"], params["w2"], params["b2"])


# --------------------------- pure-JAX reference -------------------------------

def gcn_net_reference(adjacency, feature, params):
    h = jax.nn.sigmoid(adjacency @ (feature @ params["w1"]) + params["b1"])
    h = jnp.maximum(h, 0.0)
    return jax.nn.sigmoid(adjacency @ (h @ params["w2"]) + params["b2"])


# ------------------------------ param init -----------------------------------

def _kaiming_uniform(key, shape):
    # Mirrors torch.nn.init.kaiming_uniform_ defaults on a 2-D (in, out) tensor
    # (torch computes fan_in from dim 1 of the weight tensor).
    fan_in = shape[1]
    bound = math.sqrt(6.0 / fan_in)
    return jax.random.uniform(key, shape, jnp.float32, -bound, bound)


def init_gcn_net(key, input_dim, hid_dim, output_dim):
    k1, k2 = jax.random.split(key)
    return {
        "w1": _kaiming_uniform(k1, (input_dim, hid_dim)),
        "b1": jnp.zeros((1, hid_dim), jnp.float32),    # init.zeros_(bias)
        "w2": _kaiming_uniform(k2, (hid_dim, output_dim)),
        "b2": jnp.zeros((1, output_dim), jnp.float32),
    }


# --------------------------------- main ---------------------------------------

if __name__ == "__main__":
    key = jax.random.PRNGKey(0)
    N, input_dim, hid_dim, output_dim = 16, 8, 32, 16
    k_adj, k_x, k_params = jax.random.split(key, 3)

    # Deterministic small graph: symmetric adjacency with self-loops,
    # symmetrically normalized (D^-1/2 A D^-1/2), as typically fed to a GCN.
    a = (jax.random.uniform(k_adj, (N, N)) < 0.3).astype(jnp.float32)
    a = jnp.maximum(a, a.T)
    a = a.at[jnp.arange(N), jnp.arange(N)].set(1.0)
    d_inv_sqrt = 1.0 / jnp.sqrt(a.sum(axis=1))
    adjacency = a * d_inv_sqrt[:, None] * d_inv_sqrt[None, :]

    feature = jax.random.normal(k_x, (N, input_dim), dtype=jnp.float32)
    params = init_gcn_net(k_params, input_dim, hid_dim, output_dim)

    logits = gcn_net_forward(adjacency, feature, params)
    jax.block_until_ready(logits)

    assert logits.shape == (N, output_dim)
    # Final layer ends in a sigmoid -> all outputs strictly inside (0, 1).
    assert bool(jnp.all((logits > 0.0) & (logits < 1.0)))

    # Correctness vs. pure-JAX reference.
    ref = gcn_net_reference(adjacency, feature, params)
    assert bool(jnp.allclose(logits, ref, atol=1e-5, rtol=1e-5))

    print("KERNEL_OK")
</pallas_src>

<mosaic_0001>
module attributes {stable_mosaic.version = 11 : i64} {
  func.func @gcn_net_kernel(%arg0: memref<16x16xf32, #tpu.memory_space<vmem>>, %arg1: memref<16x8xf32, #tpu.memory_space<vmem>>, %arg2: memref<8x32xf32, #tpu.memory_space<vmem>>, %arg3: memref<1x32xf32, #tpu.memory_space<vmem>>, %arg4: memref<32x16xf32, #tpu.memory_space<vmem>>, %arg5: memref<1x16xf32, #tpu.memory_space<vmem>>, %arg6: memref<16x16xf32, #tpu.memory_space<vmem>>) attributes {dimension_semantics = [], scalar_prefetch = 0 : i64, scratch_operands = 0 : i64, tpu.core_type = #tpu.core_type<tc>} {
    %c0 = arith.constant 0 : index
    %c0_0 = arith.constant 0 : index
    %0 = vector.load %arg0[%c0, %c0_0] : memref<16x16xf32, #tpu.memory_space<vmem>>, vector<16x16xf32>
    %c0_1 = arith.constant 0 : index
    %c0_2 = arith.constant 0 : index
    %1 = vector.load %arg1[%c0_1, %c0_2] : memref<16x8xf32, #tpu.memory_space<vmem>>, vector<16x8xf32>
    %c0_3 = arith.constant 0 : index
    %c0_4 = arith.constant 0 : index
    %2 = vector.load %arg2[%c0_3, %c0_4] : memref<8x32xf32, #tpu.memory_space<vmem>>, vector<8x32xf32>
    %cst = arith.constant dense<0.000000e+00> : vector<16x32xf32>
    %3 = tpu.matmul %1, %2, %cst {dimension_numbers = #tpu.dot_dimension_numbers<[1], [0], [0], [1], [0, 0, 1, 1], [], []>} : vector<16x8xf32>, vector<8x32xf32>, vector<16x32xf32> -> vector<16x32xf32>
    %cst_5 = arith.constant dense<0.000000e+00> : vector<16x32xf32>
    %4 = tpu.matmul %0, %3, %cst_5 {dimension_numbers = #tpu.dot_dimension_numbers<[1], [0], [0], [1], [0, 0, 1, 1], [], []>} : vector<16x16xf32>, vector<16x32xf32>, vector<16x32xf32> -> vector<16x32xf32>
    %c0_6 = arith.constant 0 : index
    %c0_7 = arith.constant 0 : index
    %5 = vector.load %arg3[%c0_6, %c0_7] : memref<1x32xf32, #tpu.memory_space<vmem>>, vector<1x32xf32>
    %6 = vector.broadcast %5 : vector<1x32xf32> to vector<16x32xf32>
    %7 = arith.addf %4, %6 : vector<16x32xf32>
    %cst_8 = arith.constant 0.000000e+00 : f32
    %8 = vector.broadcast %cst_8 : f32 to vector<16x32xf32>
    %9 = arith.subf %8, %7 : vector<16x32xf32>
    %10 = math.exp %9 : vector<16x32xf32>
    %cst_9 = arith.constant 1.000000e+00 : f32
    %11 = vector.broadcast %cst_9 : f32 to vector<16x32xf32>
    %12 = arith.addf %11, %10 : vector<16x32xf32>
    %cst_10 = arith.constant 1.000000e+00 : f32
    %13 = vector.broadcast %cst_10 : f32 to vector<16x32xf32>
    %14 = arith.divf %13, %12 : vector<16x32xf32>
    %cst_11 = arith.constant 0.000000e+00 : f32
    %15 = vector.broadcast %cst_11 : f32 to vector<16x32xf32>
    %16 = arith.maximumf %14, %15 : vector<16x32xf32>
    %c0_12 = arith.constant 0 : index
    %c0_13 = arith.constant 0 : index
    %17 = vector.load %arg4[%c0_12, %c0_13] : memref<32x16xf32, #tpu.memory_space<vmem>>, vector<32x16xf32>
    %cst_14 = arith.constant dense<0.000000e+00> : vector<16x16xf32>
    %18 = tpu.matmul %16, %17, %cst_14 {dimension_numbers = #tpu.dot_dimension_numbers<[1], [0], [0], [1], [0, 0, 1, 1], [], []>} : vector<16x32xf32>, vector<32x16xf32>, vector<16x16xf32> -> vector<16x16xf32>
    %cst_15 = arith.constant dense<0.000000e+00> : vector<16x16xf32>
    %19 = tpu.matmul %0, %18, %cst_15 {dimension_numbers = #tpu.dot_dimension_numbers<[1], [0], [0], [1], [0, 0, 1, 1], [], []>} : vector<16x16xf32>, vector<16x16xf32>, vector<16x16xf32> -> vector<16x16xf32>
    %c0_16 = arith.constant 0 : index
    %c0_17 = arith.constant 0 : index
    %20 = vector.load %arg5[%c0_16, %c0_17] : memref<1x16xf32, #tpu.memory_space<vmem>>, vector<1x16xf32>
    %21 = vector.broadcast %20 : vector<1x16xf32> to vector<16x16xf32>
    %22 = arith.addf %19, %21 : vector<16x16xf32>
    %cst_18 = arith.constant 0.000000e+00 : f32
    %23 = vector.broadcast %cst_18 : f32 to vector<16x16xf32>
    %24 = arith.subf %23, %22 : vector<16x16xf32>
    %25 = math.exp %24 : vector<16x16xf32>
    %cst_19 = arith.constant 1.000000e+00 : f32
    %26 = vector.broadcast %cst_19 : f32 to vector<16x16xf32>
    %27 = arith.addf %26, %25 : vector<16x16xf32>
    %cst_20 = arith.constant 1.000000e+00 : f32
    %28 = vector.broadcast %cst_20 : f32 to vector<16x16xf32>
    %29 = arith.divf %28, %27 : vector<16x16xf32>
    %c0_21 = arith.constant 0 : index
    %c0_22 = arith.constant 0 : index
    %30 = vector.load %arg6[%c0_21, %c0_22] : memref<16x16xf32, #tpu.memory_space<vmem>>, vector<16x16xf32>
    tpu.vector_store %arg6[%c0_21, %c0_22], %29 {strides = array<i32>} : memref<16x16xf32, #tpu.memory_space<vmem>>, vector<16x16xf32>,
    return
  }
}

</mosaic_0001>

<bundles_post_ra>
// kernel: tpu_custom_call.1
= control target key start
LH: loop header
LB: loop body
LE: loop exit
PB: predicated region body
PF: predicated region fallthrough
CT: control target
= control target key end

     0   :  { %vm29_vm0 = vcmask 64512   ;;  %s617_s0 = inlined_call_operand.vmem [shape: f32[16,16], index: 0, kind: input, shape index: {}]   ;;  %s618_s1 = inlined_call_operand.vmem [shape: f32[16,8], index: 1, kind: input, shape index: {}]   ;;  %s619_s2 = inlined_call_operand.vmem [shape: f32[8,32], index: 2, kind: input, shape index: {}]   ;;  %s620_s3 = inlined_call_operand.vmem [shape: f32[1,32], index: 3, kind: input, shape index: {}]   ;;  %s621_s4 = inlined_call_operand.vmem [shape: f32[32,16], index: 4, kind: input, shape index: {}]   ;;  %s622_s5 = inlined_call_operand.vmem [shape: f32[1,16], index: 5, kind: input, shape index: {}]   ;;  %s623_s6 = inlined_call_operand.hbm [shape: f32[16,16], index: 6, kind: output, shape index: {}]  }
   0x1   :  { %v28_v0 = vld [vmem:[%s619_s2] sm:$0xff]  ;;  %v27_v2 = vld [vmem:[%s618_s1 + $0x8] sm:$0xff] }
   0x2   :  { %v26_v1 = vld [vmem:[%s618_s1] sm:$0xff]  ;;  %439 = vmatprep.subr.mxu0 %v28_v0 }
   0x3   :  { %441 = vmatprep.mubr.msk.f32.mxu0 %vm29_vm0, %v26_v1 }
   0x4   :  { %11 = vsyncpa [#allocation3], 0  ;;  %440 = vmatpush3.msra.mxu0 %v28_v0  ;;  %v24_v3 = vld [vmem:[%s617_s0] sm:$0xff]  ;;  %vm118_vm1 = vcmask 130048   ;;  %v25_v7 = vld [vmem:[%s617_s0 + $0x8] sm:$0xff]  ;;  %vm218_vm2 = vcmask 261120  }
   0x5   :  { %442 = vmatmul.mubr.msk.f32.vlgmr.msra.gmra.mrb[0].mxu0 %vm29_vm0, %v27_v2  ;;  %448 = vmatprep.mubr.msk.f32.mxu1 %vm118_vm1, %v24_v3  ;;  %v214_v8 = vld [vmem:[%s621_s4] sm:$0xff]  ;;  %v215_v9 = vld [vmem:[%s621_s4 + $0x8] sm:$0xff]  ;;  %v216_v11 = vld [vmem:[%s621_s4 + $0x10] sm:$0xff]  ;;  %s528_s14 = smov [#allocation2]  }
   0x6   :  { %v473_v10 = vpack.c.bf16 %v215_v9, %v214_v8  ;;  %v217_v12 = vld [vmem:[%s621_s4 + $0x18] sm:$0xff]  ;;  %v414_v14 = vld [vmem:[%s620_s3] ss:$0 sm:$0xff]  ;;  %s401_s15 = sshll.u32 %s528_s14, 4  ;;  %s402_s15 = int_to_ptr.vmem [resolvable:$true] %s401_s15 }
   0x7   :  { %v477_v13 = vpack.c.bf16 %v217_v12, %v216_v11  ;;  %v419_v34 = vld [vmem:[%s622_s5] ss:$0 sm:$0xff]  ;;  %s504_s5 = scalar_lea.vmem %s402_s15, 256  ;;  %p509_p1 = scmp.lt.s32.totalorder %s402_s15, %s402_s15 }
   0x8   :  { %474 = vmatprep.subr.bf16.mxu0 %v473_v10  ;;  %p505_p0 = scmp.ne.s32.totalorder %s402_s15, %s504_s5  ;;  %p510_p2 = scmp.lt.s32.totalorder %s504_s5, %s504_s5 }
   0x9   :  { %476 = vmatpush3.bf16.msra.mxu0 %v473_v10 }
   0xa   :  { %478 = vmatprep.subr.bf16.mxu0 %v477_v13  ;;  %p511_p3 = por %p510_p2, %p509_p1 }
   0xc   :  { %p512_p4 = pnand %p511_p3, %p505_p0 }
   0xd   :  { %480 = vmatpush3.bf16.msra.mxu0 %v477_v13 }
  0xd8   :  { %v443_v4 = vpop.f32.mrb[0].mxu0 }
  0xd9   :  { %v102_v5 = vpop.f32.mrb[1].mxu0 }
  0xda   :  { %v469_v6 = vpack.c.bf16 %v443_v4, %v102_v5 }
  0xdc   :  { %470 = vmatprep.subr.bf16.mxu1 %v469_v6 }
  0xdd   :  { %472 = vmatpush3.bf16.msra.mxu1 %v469_v6 }
  0xe0   :  { %449 = vmatmul.mubr.msk.f32.vlgmr.msra.gmra.mrb[0].mxu1 %vm118_vm1, %v25_v7 }
  0xe1   :  { %466 = vmatprep.mubr.msk.f32.mxu1 %vm118_vm1, %v24_v3 }
 0x1b3   :  { %v450_v15 = vpop.f32.mrb[0].mxu1 }
 0x1b4   :  { %v197_v16 = vadd.f32 %v450_v15, %v414_v14  ;;  %v191_v17 = vpop.f32.mrb[1].mxu1 }
 0x1b5   :  { %v192_v18 = vadd.f32 %v414_v14, %v191_v17 }
 0x1b6   :  { %v201_v19 = vsub.f32 0.0, %v197_v16 }
 0x1b7   :  { %v200_v20 = vsub.f32 0.0, %v192_v18 }
 0x1b8   :  { %v204_v21 = vmul.f32 1.442695, %v201_v19 }
 0x1b9   :  { %v202_v22 = vmul.f32 1.442695, %v200_v20 }
 0x1ba   :  { %488 = vpow2.f32 %v204_v21 }
 0x1bb   :  { %490 = vpow2.f32 %v202_v22 }
 0x1c4   :  { %v489_v23 = vpop.eup %488 }
 0x1c5   :  { %v491_v24 = vpop.eup %490  ;;  %v207_v25 = vadd.f32 1.0, %v489_v23 }
 0x1c6   :  { %v206_v26 = vadd.f32 1.0, %v491_v24 }
 0x1c7   :  { %492 = vrcp.f32 %v207_v25 }
 0x1c8   :  { %494 = vrcp.f32 %v206_v26 }
 0x1d1   :  { %v493_v27 = vpop.eup %492 }
 0x1d2   :  { %v495_v28 = vpop.eup %494  ;;  %v213_v30 = vmax.f32 %v493_v27, 0.0 }
 0x1d3   :  { %v212_v29 = vmax.f32 %v495_v28, 0.0 }
 0x1d5   :  { %459 = vmatprep.mubr.msk.f32.mxu0 %vm218_vm2, %v212_v29 }
 0x1d6   :  { %460 = vmatmul.mubr.msk.f32.vlgmr.msra.gmra.mrb[2].mxu0 %vm218_vm2, %v213_v30 }
 0x2a9   :  { %v461_v31 = vpop.f32.mrb[2].mxu0 }
 0x2aa   :  { %v291_v32 = vpop.f32.mrb[3].mxu0 }
 0x2ab   :  { %v481_v33 = vpack.c.bf16 %v461_v31, %v291_v32 }
 0x2ad   :  { %482 = vmatprep.subr.bf16.mxu1 %v481_v33 }
 0x2ae   :  { %484 = vmatpush3.bf16.msra.mxu1 %v481_v33 }
 0x2b1   :  { %467 = vmatmul.mubr.msk.f32.vlgmr.msra.gmra.mrb[2].mxu1 %vm118_vm1, %v25_v7 }
 0x384   :  { %v468_v35 = vpop.f32.mrb[2].mxu1 }
 0x385   :  { %v379_v36 = vadd.f32 %v468_v35, %v419_v34  ;;  %v373_v37 = vpop.f32.mrb[3].mxu1 }
 0x386   :  { %v374_v38 = vadd.f32 %v419_v34, %v373_v37 }
 0x387   :  { %v383_v39 = vsub.f32 0.0, %v379_v36 }
 0x388   :  { %v382_v40 = vsub.f32 0.0, %v374_v38 }
 0x389   :  { %v386_v41 = vmul.f32 1.442695, %v383_v39 }
 0x38a   :  { %v384_v42 = vmul.f32 1.442695, %v382_v40 }
 0x38b   :  { %496 = vpow2.f32 %v386_v41 }
 0x38c   :  { %498 = vpow2.f32 %v384_v42 }
 0x395   :  { %v497_v43 = vpop.eup %496 }
 0x396   :  { %v499_v44 = vpop.eup %498  ;;  %v389_v45 = vadd.f32 1.0, %v497_v43 }
 0x397   :  { %v388_v46 = vadd.f32 1.0, %v499_v44 }
 0x398   :  { %500 = vrcp.f32 %v389_v45 }
 0x399   :  { %502 = vrcp.f32 %v388_v46 }
 0x3a2   :  { %v501_v47 = vpop.eup %500 }
 0x3a3   :  { %v503_v48 = vpop.eup %502  ;;  %395 = vst.msk [vmem:[#allocation2 + $0x8] sm:$0xff] %vm118_vm1, %v501_v47 }
 0x3a4   :  { %394 = vst.msk [vmem:[#allocation2] sm:$0xff] %vm118_vm1, %v503_v48 }
 0x3a5   :  { %515 = shalt.err (!%p512_p4)
}
 0x3a6   :  { %s516_s18 = scalar_lea.hbm %s623_s6, 256 }
 0x3a7   :  { %p517_p5 = scmp.ne.s32.totalorder %s623_s6, %s516_s18  ;;  %p520_p6 = scmp.lt.u32.totalorder %s516_s18, %s623_s6 }
 0x3a9   :  { %p522_p7 = pnand %p520_p6, %p517_p5 }
 0x3ab   :  { %525 = shalt.err (!%p522_p7)
}
 0x3ac   :  { %s529_s23 = smov 128   ;;  %s530_s24 = smov 8  }
 0x3ad   :  { %407 = dma.vmem_to_hbm [thread:$0]  %s402_s15, 256, %s623_s6, [#allocation3], %s529_s23, %s529_s23, %s530_s24  }
 0x3ae   :  { %526 = dma.done.wait [#allocation3], 256  }
 0x3af   :  { %527 = vsyncadd [#allocation3], 4294967040 }
 0x3b0   :  { %411 = vsyncpa [#allocation3], 1 }

</bundles_post_ra>
